<compile_context>
chip_gen: v6e
topology: v6e:2x2x1
jax: 0.10.0
libtpu: 0.0.40
codegen_flags: <defaults>
</compile_context>

<pallas_src>
import numpy as np

import jax
import jax.numpy as jnp
from jax.experimental import pallas as pl
from jax.experimental.pallas import tpu as pltpu


def _relu(v):
    return jnp.maximum(v, 0.0)


def _sigmoid(v):
    # Numerically stable sigmoid via tanh (EUP); matches torch.sigmoid.
    return 0.5 * (jnp.tanh(0.5 * v) + 1.0)


class _LayerGeom:
    """Static geometry of one conv3x3(pad) -> maxpool2x2(floor) stage."""

    def __init__(self, Hin, Win, Cin, Cout, pad_h, pad_w):
        self.Hin, self.Win, self.Cin, self.Cout = Hin, Win, Cin, Cout
        self.pad_h, self.pad_w = pad_h, pad_w
        self.Hp, self.Wp = Hin + 2 * pad_h, Win + 2 * pad_w   # padded input
        self.Hc, self.Wc = self.Hp - 2, self.Wp - 2           # conv output
        self.Ho, self.Wo = self.Hc // 2, self.Wc // 2         # pooled output
        assert self.Wc == 2 * self.Wo, "kernel assumes an even conv width"
        self.lanes_in = self.Wp * Cin     # lanes of one padded activation row
        self.lanes_out = self.Wo * Cout   # lanes of one pooled activation row
        # Even per-sample row-segment height of the padded slab.  It must hold
        # the whole padded image (Hp rows) and keep the 4-row window of the
        # last pooled row (rows 2*(Ho-1)..2*(Ho-1)+3) inside the segment so
        # nothing leaks across sample boundaries.
        self.Hs = max(self.Hp, 2 * self.Ho + 2)
        self.Hs += self.Hs % 2            # even -> uniform stride-2 reads


def _net_geometry(H, W):
    g1 = _LayerGeom(H, W, 1, 6, 2, 1)
    g2 = _LayerGeom(g1.Ho, g1.Wo, 6, 6, 2, 1)
    g3 = _LayerGeom(g2.Ho, g2.Wo, 6, 1, 1, 1)
    return (g1, g2, g3)


def _build_conv_matrix(w_oihw, g, dtype=jnp.bfloat16):
    """Fused conv3x3 + 2x2-maxpool matrix, shape (4*Wp*Cin, 4*Wo*Cout).

    K index q = kh*(Wp*Cin) + wi*Cin + ci      (kh: row offset 0..3 of the LHS)
    N index j = ((2*hp + wp)*Wo + wo)*Cout + co (hp/wp: H/W pooling parity)
    M[q, j]   = w[co, ci, kh - hp, wi - 2*wo - wp]  (0 outside the 3x3 kernel)

    dot(LHS, M), where LHS row r lane-concatenates padded rows 2r..2r+3, gives
    the four conv values of pooled cell (r, wo, co) in four lane groups.
    """
    w = jnp.asarray(w_oihw, jnp.float32)                  # (Cout, Cin, 3, 3)
    Cout, Cin, KH, KW = w.shape
    kh = np.arange(4)
    hp = np.arange(2)
    dh = np.arange(KH)
    sel_h = (kh[:, None, None] == hp[None, :, None] + dh[None, None, :])
    wi = np.arange(g.Wp)
    wp = np.arange(2)
    wo = np.arange(g.Wo)
    kw = np.arange(KW)
    sel_w = (wi[:, None, None, None] ==
             2 * wo[None, None, :, None] + wp[None, :, None, None]
             + kw[None, None, None, :])
    w_t = jnp.transpose(w, (2, 3, 1, 0))                  # (dh, kw, Cin, Cout)
    m = jnp.einsum("apd,vqok,dkic->avipqoc",
                   sel_h.astype(np.float32), sel_w.astype(np.float32), w_t,
                   precision=jax.lax.Precision.HIGHEST)
    # axes: (kh, wi, ci, hp, wp, wo, co) -> (4*Wp*Cin, 4*Wo*Cout)
    return m.reshape(4 * g.Wp * g.Cin, 4 * g.Wo * g.Cout).astype(dtype)


def _tile_bias(b, g):
    """Per-lane bias for the (wo*Cout + co) pooled-row layout: (1, Wo*Cout)."""
    return jnp.tile(jnp.asarray(b, jnp.float32), g.Wo).reshape(1, g.lanes_out)


def _make_kernel(geoms, N):
    acts = (_relu, _relu, _sigmoid)

    def kernel(x_ref, m1_ref, b1_ref, m2_ref, b2_ref, m3_ref, b3_ref,
               o_ref, s1, s2, s3, lhs_buf):
        slabs = (s1, s2, s3)
        mats = (m1_ref, m2_ref, m3_ref)
        biases = (b1_ref, b2_ref, b3_ref)

        # One-time zero fill of the padded slabs (interiors are overwritten;
        # only the borders must stay zero).
        for s in slabs:
            s[...] = jnp.zeros_like(s)

        # Place the batch into layer-1's slab interiors (Cin == 1).
        g0 = geoms[0]
        for n in range(N):
            r0 = n * g0.Hs + g0.pad_h
            s1[r0:r0 + g0.Hin, g0.pad_w:g0.pad_w + g0.Win] = x_ref[n]

        for i, (g, s, m_ref, b_ref, act) in enumerate(
                zip(geoms, slabs, mats, biases, acts)):
            Rp = N * (g.Hs // 2)     # pooled rows across the stacked batch
            li = g.lanes_in
            L = g.lanes_out

            # LHS row r = lane-concat of slab rows 2r, 2r+1, 2r+2, 2r+3.
            # Staged through a small VMEM buffer (4 stride-2 row reads into
            # contiguous lane blocks) instead of an unaligned in-register lane
            # concatenation; all Rp x 4*li lanes are rewritten each layer.
            for kh in range(4):
                lhs_buf[0:Rp, kh * li:(kh + 1) * li] = \
                    s[pl.ds(kh, Rp, stride=2), :]
            lhs = lhs_buf[0:Rp, 0:4 * li].astype(jnp.bfloat16)

            # conv3x3 fused with the 2x2 max-pool: one bf16 MXU matmul, then a
            # max over the four (H-parity, W-parity) lane groups.
            y = jnp.dot(lhs, m_ref[...], preferred_element_type=jnp.float32)
            pooled = jnp.maximum(
                jnp.maximum(y[:, 0:L], y[:, L:2 * L]),
                jnp.maximum(y[:, 2 * L:3 * L], y[:, 3 * L:4 * L]))

            # Per-channel bias (commutes with the max-pool) + activation.
            out = act(pooled + b_ref[...])               # (Rp, Wo*Cout), f32

            if i + 1 < len(geoms):
                ng = geoms[i + 1]
                nxt = slabs[i + 1]
                c0 = ng.pad_w * ng.Cin
                for n in range(N):
                    nxt[n * ng.Hs + ng.pad_h:
                        n * ng.Hs + ng.pad_h + ng.Hin,
                        c0:c0 + L] = out[n * (g.Hs // 2):
                                         n * (g.Hs // 2) + g.Ho, :]
            else:
                # Last layer: Cout == 1, so (Ho, Wo*Cout) == (Ho, Wo).
                for n in range(N):
                    o_ref[n] = out[n * (g.Hs // 2):
                                   n * (g.Hs // 2) + g.Ho, :]

    return kernel


def cnn_forward(x_nchw, params):
    """Pallas implementation of CNN.forward: (N, 1, 16, 16) -> (N, 1, 2, 2)."""
    N, Cin, H, W = x_nchw.shape
    assert Cin == 1
    geoms = _net_geometry(H, W)
    g1, g2, g3 = geoms

    x = x_nchw.reshape(N, H, W).astype(jnp.float32)
    m1 = _build_conv_matrix(params["w1"], g1)
    m2 = _build_conv_matrix(params["w2"], g2)
    m3 = _build_conv_matrix(params["w3"], g3)
    b1 = _tile_bias(params["b1"], g1)
    b2 = _tile_bias(params["b2"], g2)
    b3 = _tile_bias(params["b3"], g3)

    def r8(r):                       # round rows up to a sublane multiple
        return -(-r // 8) * 8

    max_rp = max(N * (g.Hs // 2) for g in geoms)
    max_k = max(4 * g.lanes_in for g in geoms)

    out = pl.pallas_call(
        _make_kernel(geoms, N),
        out_shape=jax.ShapeDtypeStruct((N, g3.Ho, g3.Wo), jnp.float32),
        # No grid: a single invocation; every input / the output is a whole
        # array in VMEM (total footprint << 1 MiB on all of v5e/v6e/v7x).
        scratch_shapes=[
            pltpu.VMEM((r8(N * g1.Hs + 2), g1.lanes_in), jnp.float32),  # slab1
            pltpu.VMEM((r8(N * g2.Hs + 2), g2.lanes_in), jnp.float32),  # slab2
            pltpu.VMEM((r8(N * g3.Hs + 2), g3.lanes_in), jnp.float32),  # slab3
            pltpu.VMEM((r8(max_rp), max_k), jnp.float32),               # LHS
        ],
    )(x, m1, b1, m2, b2, m3, b3)

    return out.reshape(N, 1, g3.Ho, g3.Wo)


def cnn_forward_ref(x_nchw, params):
    """Pure-JAX reference mirroring the PyTorch module exactly (NCHW, f32)."""
    def conv(x, w, b, ph, pw):
        y = jax.lax.conv_general_dilated(
            x, w, window_strides=(1, 1), padding=((ph, ph), (pw, pw)),
            dimension_numbers=("NCHW", "OIHW", "NCHW"),
            precision=jax.lax.Precision.HIGHEST)
        return y + b.reshape(1, -1, 1, 1)

    def pool(x):
        return jax.lax.reduce_window(x, -jnp.inf, jax.lax.max,
                                     (1, 1, 2, 2), (1, 1, 2, 2), "VALID")

    x = jax.nn.relu(pool(conv(x_nchw, params["w1"], params["b1"], 2, 1)))
    x = jax.nn.relu(pool(conv(x, params["w2"], params["b2"], 2, 1)))
    x = jax.nn.sigmoid(pool(conv(x, params["w3"], params["b3"], 1, 1)))
    return x


if __name__ == "__main__":
    key = jax.random.PRNGKey(0)
    kx, k1, k2, k3, k4, k5, k6 = jax.random.split(key, 7)

    # Deterministic synthetic parameters (shapes from CNN.__init__).
    params = {
        "w1": 0.3 * jax.random.normal(k1, (6, 1, 3, 3), jnp.float32),
        "b1": 0.1 * jax.random.normal(k2, (6,), jnp.float32),
        "w2": 0.2 * jax.random.normal(k3, (6, 6, 3, 3), jnp.float32),
        "b2": 0.1 * jax.random.normal(k4, (6,), jnp.float32),
        "w3": 0.2 * jax.random.normal(k5, (1, 6, 3, 3), jnp.float32),
        "b3": 0.1 * jax.random.normal(k6, (1,), jnp.float32),
    }
    x = jax.random.normal(kx, (2, 1, 16, 16), jnp.float32)   # NCHW, Cin = 1

    out = jax.block_until_ready(jax.jit(cnn_forward)(x, params))
    ref = jax.block_until_ready(cnn_forward_ref(x, params))

    assert out.shape == (2, 1, 2, 2), out.shape
    max_diff = float(jnp.max(jnp.abs(out - ref)))
    # bf16 MXU operands with f32 accumulation: sigmoid outputs match the f32
    # reference to ~1e-2; 2.5e-2 still catches any layout / indexing bug
    # (those show up at O(1e-1) on a sigmoid output).
    assert max_diff < 2.5e-2, f"max abs diff {max_diff}"
    print("KERNEL_OK")
</pallas_src>

<mosaic_0001>
module attributes {stable_mosaic.version = 11 : i64} {
  func.func @kernel(%arg0: memref<2x16x16xf32, #tpu.memory_space<vmem>>, %arg1: memref<72x192xbf16, #tpu.memory_space<vmem>>, %arg2: memref<1x48xf32, #tpu.memory_space<vmem>>, %arg3: memref<240x96xbf16, #tpu.memory_space<vmem>>, %arg4: memref<1x24xf32, #tpu.memory_space<vmem>>, %arg5: memref<144x8xbf16, #tpu.memory_space<vmem>>, %arg6: memref<1x2xf32, #tpu.memory_space<vmem>>, %arg7: memref<2x2x2xf32, #tpu.memory_space<vmem>>, %arg8: memref<48x18xf32, #tpu.memory_space<vmem>>, %arg9: memref<32x60xf32, #tpu.memory_space<vmem>>, %arg10: memref<24x36xf32, #tpu.memory_space<vmem>>, %arg11: memref<24x240xf32, #tpu.memory_space<vmem>>) attributes {dimension_semantics = [], scalar_prefetch = 0 : i64, scratch_operands = 4 : i64, tpu.core_type = #tpu.core_type<tc>} {
    %cst = arith.constant 0.000000e+00 : f32
    %0 = vector.broadcast %cst : f32 to vector<48x18xf32>
    %c0 = arith.constant 0 : index
    %c0_0 = arith.constant 0 : index
    %1 = vector.load %arg8[%c0, %c0_0] : memref<48x18xf32, #tpu.memory_space<vmem>>, vector<48x18xf32>
    tpu.vector_store %arg8[%c0, %c0_0], %0 {strides = array<i32>} : memref<48x18xf32, #tpu.memory_space<vmem>>, vector<48x18xf32>,
    %cst_1 = arith.constant 0.000000e+00 : f32
    %2 = vector.broadcast %cst_1 : f32 to vector<32x60xf32>
    %c0_2 = arith.constant 0 : index
    %c0_3 = arith.constant 0 : index
    %3 = vector.load %arg9[%c0_2, %c0_3] : memref<32x60xf32, #tpu.memory_space<vmem>>, vector<32x60xf32>
    tpu.vector_store %arg9[%c0_2, %c0_3], %2 {strides = array<i32>} : memref<32x60xf32, #tpu.memory_space<vmem>>, vector<32x60xf32>,
    %cst_4 = arith.constant 0.000000e+00 : f32
    %4 = vector.broadcast %cst_4 : f32 to vector<24x36xf32>
    %c0_5 = arith.constant 0 : index
    %c0_6 = arith.constant 0 : index
    %5 = vector.load %arg10[%c0_5, %c0_6] : memref<24x36xf32, #tpu.memory_space<vmem>>, vector<24x36xf32>
    tpu.vector_store %arg10[%c0_5, %c0_6], %4 {strides = array<i32>} : memref<24x36xf32, #tpu.memory_space<vmem>>, vector<24x36xf32>,
    %c0_7 = arith.constant 0 : index
    %c0_8 = arith.constant 0 : index
    %c0_9 = arith.constant 0 : index
    %6 = vector.load %arg0[%c0_7, %c0_8, %c0_9] : memref<2x16x16xf32, #tpu.memory_space<vmem>>, vector<1x16x16xf32>
    %7 = vector.shape_cast %6 : vector<1x16x16xf32> to vector<16x16xf32>
    %c2 = arith.constant 2 : index
    %c1 = arith.constant 1 : index
    %8 = vector.load %arg8[%c2, %c1] : memref<48x18xf32, #tpu.memory_space<vmem>>, vector<16x16xf32>
    tpu.vector_store %arg8[%c2, %c1], %7 {strides = array<i32>} : memref<48x18xf32, #tpu.memory_space<vmem>>, vector<16x16xf32>,
    %c1_10 = arith.constant 1 : index
    %c0_11 = arith.constant 0 : index
    %c0_12 = arith.constant 0 : index
    %9 = vector.load %arg0[%c1_10, %c0_11, %c0_12] : memref<2x16x16xf32, #tpu.memory_space<vmem>>, vector<1x16x16xf32>
    %10 = vector.shape_cast %9 : vector<1x16x16xf32> to vector<16x16xf32>
    %c22 = arith.constant 22 : index
    %c1_13 = arith.constant 1 : index
    %11 = vector.load %arg8[%c22, %c1_13] : memref<48x18xf32, #tpu.memory_space<vmem>>, vector<16x16xf32>
    tpu.vector_store %arg8[%c22, %c1_13], %10 {strides = array<i32>} : memref<48x18xf32, #tpu.memory_space<vmem>>, vector<16x16xf32>,
    %c0_14 = arith.constant 0 : index
    %c0_15 = arith.constant 0 : index
    %12 = tpu.strided_load %arg8[%c0_14, %c0_15] {strides = array<i32: 2, 1>} : memref<48x18xf32, #tpu.memory_space<vmem>>, vector<20x18xf32>
    %c0_16 = arith.constant 0 : index
    %c0_17 = arith.constant 0 : index
    %13 = vector.load %arg11[%c0_16, %c0_17] : memref<24x240xf32, #tpu.memory_space<vmem>>, vector<20x18xf32>
    tpu.vector_store %arg11[%c0_16, %c0_17], %12 {strides = array<i32>} : memref<24x240xf32, #tpu.memory_space<vmem>>, vector<20x18xf32>,
    %c1_18 = arith.constant 1 : index
    %c0_19 = arith.constant 0 : index
    %14 = tpu.strided_load %arg8[%c1_18, %c0_19] {strides = array<i32: 2, 1>} : memref<48x18xf32, #tpu.memory_space<vmem>>, vector<20x18xf32>
    %c0_20 = arith.constant 0 : index
    %c18 = arith.constant 18 : index
    %15 = vector.load %arg11[%c0_20, %c18] : memref<24x240xf32, #tpu.memory_space<vmem>>, vector<20x18xf32>
    tpu.vector_store %arg11[%c0_20, %c18], %14 {strides = array<i32>} : memref<24x240xf32, #tpu.memory_space<vmem>>, vector<20x18xf32>,
    %c2_21 = arith.constant 2 : index
    %c0_22 = arith.constant 0 : index
    %16 = tpu.strided_load %arg8[%c2_21, %c0_22] {strides = array<i32: 2, 1>} : memref<48x18xf32, #tpu.memory_space<vmem>>, vector<20x18xf32>
    %c0_23 = arith.constant 0 : index
    %c36 = arith.constant 36 : index
    %17 = vector.load %arg11[%c0_23, %c36] : memref<24x240xf32, #tpu.memory_space<vmem>>, vector<20x18xf32>
    tpu.vector_store %arg11[%c0_23, %c36], %16 {strides = array<i32>} : memref<24x240xf32, #tpu.memory_space<vmem>>, vector<20x18xf32>,
    %c3 = arith.constant 3 : index
    %c0_24 = arith.constant 0 : index
    %18 = tpu.strided_load %arg8[%c3, %c0_24] {strides = array<i32: 2, 1>} : memref<48x18xf32, #tpu.memory_space<vmem>>, vector<20x18xf32>
    %c0_25 = arith.constant 0 : index
    %c54 = arith.constant 54 : index
    %19 = vector.load %arg11[%c0_25, %c54] : memref<24x240xf32, #tpu.memory_space<vmem>>, vector<20x18xf32>
    tpu.vector_store %arg11[%c0_25, %c54], %18 {strides = array<i32>} : memref<24x240xf32, #tpu.memory_space<vmem>>, vector<20x18xf32>,
    %c0_26 = arith.constant 0 : index
    %c0_27 = arith.constant 0 : index
    %20 = vector.load %arg11[%c0_26, %c0_27] : memref<24x240xf32, #tpu.memory_space<vmem>>, vector<20x72xf32>
    %21 = arith.truncf %20 : vector<20x72xf32> to vector<20x72xbf16>
    %c0_28 = arith.constant 0 : index
    %c0_29 = arith.constant 0 : index
    %22 = vector.load %arg1[%c0_28, %c0_29] : memref<72x192xbf16, #tpu.memory_space<vmem>>, vector<72x192xbf16>
    %cst_30 = arith.constant dense<0.000000e+00> : vector<20x192xf32>
    %23 = tpu.matmul %21, %22, %cst_30 {dimension_numbers = #tpu.dot_dimension_numbers<[1], [0], [0], [1], [0, 0, 1, 1], [], []>} : vector<20x72xbf16>, vector<72x192xbf16>, vector<20x192xf32> -> vector<20x192xf32>
    %24 = vector.extract_strided_slice %23 {offsets = [0, 0], sizes = [20, 48], strides = [1, 1]} : vector<20x192xf32> to vector<20x48xf32>
    %25 = vector.extract_strided_slice %23 {offsets = [0, 48], sizes = [20, 48], strides = [1, 1]} : vector<20x192xf32> to vector<20x48xf32>
    %26 = arith.maximumf %24, %25 : vector<20x48xf32>
    %27 = vector.extract_strided_slice %23 {offsets = [0, 96], sizes = [20, 48], strides = [1, 1]} : vector<20x192xf32> to vector<20x48xf32>
    %28 = vector.extract_strided_slice %23 {offsets = [0, 144], sizes = [20, 48], strides = [1, 1]} : vector<20x192xf32> to vector<20x48xf32>
    %29 = arith.maximumf %27, %28 : vector<20x48xf32>
    %30 = arith.maximumf %26, %29 : vector<20x48xf32>
    %c0_31 = arith.constant 0 : index
    %c0_32 = arith.constant 0 : index
    %31 = vector.load %arg2[%c0_31, %c0_32] : memref<1x48xf32, #tpu.memory_space<vmem>>, vector<1x48xf32>
    %32 = vector.broadcast %31 : vector<1x48xf32> to vector<20x48xf32>
    %33 = arith.addf %30, %32 : vector<20x48xf32>
    %cst_33 = arith.constant 0.000000e+00 : f32
    %34 = vector.broadcast %cst_33 : f32 to vector<20x48xf32>
    %35 = arith.maximumf %33, %34 : vector<20x48xf32>
    %36 = vector.extract_strided_slice %35 {offsets = [0, 0], sizes = [9, 48], strides = [1, 1]} : vector<20x48xf32> to vector<9x48xf32>
    %c2_34 = arith.constant 2 : index
    %c6 = arith.constant 6 : index
    %37 = vector.load %arg9[%c2_34, %c6] : memref<32x60xf32, #tpu.memory_space<vmem>>, vector<9x48xf32>
    tpu.vector_store %arg9[%c2_34, %c6], %36 {strides = array<i32>} : memref<32x60xf32, #tpu.memory_space<vmem>>, vector<9x48xf32>,
    %38 = vector.extract_strided_slice %35 {offsets = [10, 0], sizes = [9, 48], strides = [1, 1]} : vector<20x48xf32> to vector<9x48xf32>
    %c16 = arith.constant 16 : index
    %c6_35 = arith.constant 6 : index
    %39 = vector.load %arg9[%c16, %c6_35] : memref<32x60xf32, #tpu.memory_space<vmem>>, vector<9x48xf32>
    tpu.vector_store %arg9[%c16, %c6_35], %38 {strides = array<i32>} : memref<32x60xf32, #tpu.memory_space<vmem>>, vector<9x48xf32>,
    %c0_36 = arith.constant 0 : index
    %c0_37 = arith.constant 0 : index
    %40 = tpu.strided_load %arg9[%c0_36, %c0_37] {strides = array<i32: 2, 1>} : memref<32x60xf32, #tpu.memory_space<vmem>>, vector<14x60xf32>
    %c0_38 = arith.constant 0 : index
    %c0_39 = arith.constant 0 : index
    %41 = vector.load %arg11[%c0_38, %c0_39] : memref<24x240xf32, #tpu.memory_space<vmem>>, vector<14x60xf32>
    tpu.vector_store %arg11[%c0_38, %c0_39], %40 {strides = array<i32>} : memref<24x240xf32, #tpu.memory_space<vmem>>, vector<14x60xf32>,
    %c1_40 = arith.constant 1 : index
    %c0_41 = arith.constant 0 : index
    %42 = tpu.strided_load %arg9[%c1_40, %c0_41] {strides = array<i32: 2, 1>} : memref<32x60xf32, #tpu.memory_space<vmem>>, vector<14x60xf32>
    %c0_42 = arith.constant 0 : index
    %c60 = arith.constant 60 : index
    %43 = vector.load %arg11[%c0_42, %c60] : memref<24x240xf32, #tpu.memory_space<vmem>>, vector<14x60xf32>
    tpu.vector_store %arg11[%c0_42, %c60], %42 {strides = array<i32>} : memref<24x240xf32, #tpu.memory_space<vmem>>, vector<14x60xf32>,
    %c2_43 = arith.constant 2 : index
    %c0_44 = arith.constant 0 : index
    %44 = tpu.strided_load %arg9[%c2_43, %c0_44] {strides = array<i32: 2, 1>} : memref<32x60xf32, #tpu.memory_space<vmem>>, vector<14x60xf32>
    %c0_45 = arith.constant 0 : index
    %c120 = arith.constant 120 : index
    %45 = vector.load %arg11[%c0_45, %c120] : memref<24x240xf32, #tpu.memory_space<vmem>>, vector<14x60xf32>
    tpu.vector_store %arg11[%c0_45, %c120], %44 {strides = array<i32>} : memref<24x240xf32, #tpu.memory_space<vmem>>, vector<14x60xf32>,
    %c3_46 = arith.constant 3 : index
    %c0_47 = arith.constant 0 : index
    %46 = tpu.strided_load %arg9[%c3_46, %c0_47] {strides = array<i32: 2, 1>} : memref<32x60xf32, #tpu.memory_space<vmem>>, vector<14x60xf32>
    %c0_48 = arith.constant 0 : index
    %c180 = arith.constant 180 : index
    %47 = vector.load %arg11[%c0_48, %c180] : memref<24x240xf32, #tpu.memory_space<vmem>>, vector<14x60xf32>
    tpu.vector_store %arg11[%c0_48, %c180], %46 {strides = array<i32>} : memref<24x240xf32, #tpu.memory_space<vmem>>, vector<14x60xf32>,
    %c0_49 = arith.constant 0 : index
    %c0_50 = arith.constant 0 : index
    %48 = vector.load %arg11[%c0_49, %c0_50] : memref<24x240xf32, #tpu.memory_space<vmem>>, vector<14x240xf32>
    %49 = arith.truncf %48 : vector<14x240xf32> to vector<14x240xbf16>
    %c0_51 = arith.constant 0 : index
    %c0_52 = arith.constant 0 : index
    %50 = vector.load %arg3[%c0_51, %c0_52] : memref<240x96xbf16, #tpu.memory_space<vmem>>, vector<240x96xbf16>
    %cst_53 = arith.constant dense<0.000000e+00> : vector<14x96xf32>
    %51 = tpu.matmul %49, %50, %cst_53 {dimension_numbers = #tpu.dot_dimension_numbers<[1], [0], [0], [1], [0, 0, 1, 1], [], []>} : vector<14x240xbf16>, vector<240x96xbf16>, vector<14x96xf32> -> vector<14x96xf32>
    %52 = vector.extract_strided_slice %51 {offsets = [0, 0], sizes = [14, 24], strides = [1, 1]} : vector<14x96xf32> to vector<14x24xf32>
    %53 = vector.extract_strided_slice %51 {offsets = [0, 24], sizes = [14, 24], strides = [1, 1]} : vector<14x96xf32> to vector<14x24xf32>
    %54 = arith.maximumf %52, %53 : vector<14x24xf32>
    %55 = vector.extract_strided_slice %51 {offsets = [0, 48], sizes = [14, 24], strides = [1, 1]} : vector<14x96xf32> to vector<14x24xf32>
    %56 = vector.extract_strided_slice %51 {offsets = [0, 72], sizes = [14, 24], strides = [1, 1]} : vector<14x96xf32> to vector<14x24xf32>
    %57 = arith.maximumf %55, %56 : vector<14x24xf32>
    %58 = arith.maximumf %54, %57 : vector<14x24xf32>
    %c0_54 = arith.constant 0 : index
    %c0_55 = arith.constant 0 : index
    %59 = vector.load %arg4[%c0_54, %c0_55] : memref<1x24xf32, #tpu.memory_space<vmem>>, vector<1x24xf32>
    %60 = vector.broadcast %59 : vector<1x24xf32> to vector<14x24xf32>
    %61 = arith.addf %58, %60 : vector<14x24xf32>
    %cst_56 = arith.constant 0.000000e+00 : f32
    %62 = vector.broadcast %cst_56 : f32 to vector<14x24xf32>
    %63 = arith.maximumf %61, %62 : vector<14x24xf32>
    %64 = vector.extract_strided_slice %63 {offsets = [0, 0], sizes = [5, 24], strides = [1, 1]} : vector<14x24xf32> to vector<5x24xf32>
    %c1_57 = arith.constant 1 : index
    %c6_58 = arith.constant 6 : index
    %65 = vector.load %arg10[%c1_57, %c6_58] : memref<24x36xf32, #tpu.memory_space<vmem>>, vector<5x24xf32>
    tpu.vector_store %arg10[%c1_57, %c6_58], %64 {strides = array<i32>} : memref<24x36xf32, #tpu.memory_space<vmem>>, vector<5x24xf32>,
    %66 = vector.extract_strided_slice %63 {offsets = [7, 0], sizes = [5, 24], strides = [1, 1]} : vector<14x24xf32> to vector<5x24xf32>
    %c9 = arith.constant 9 : index
    %c6_59 = arith.constant 6 : index
    %67 = vector.load %arg10[%c9, %c6_59] : memref<24x36xf32, #tpu.memory_space<vmem>>, vector<5x24xf32>
    tpu.vector_store %arg10[%c9, %c6_59], %66 {strides = array<i32>} : memref<24x36xf32, #tpu.memory_space<vmem>>, vector<5x24xf32>,
    %c0_60 = arith.constant 0 : index
    %c0_61 = arith.constant 0 : index
    %68 = tpu.strided_load %arg10[%c0_60, %c0_61] {strides = array<i32: 2, 1>} : memref<24x36xf32, #tpu.memory_space<vmem>>, vector<8x36xf32>
    %c0_62 = arith.constant 0 : index
    %c0_63 = arith.constant 0 : index
    %69 = vector.load %arg11[%c0_62, %c0_63] : memref<24x240xf32, #tpu.memory_space<vmem>>, vector<8x36xf32>
    tpu.vector_store %arg11[%c0_62, %c0_63], %68 {strides = array<i32>} : memref<24x240xf32, #tpu.memory_space<vmem>>, vector<8x36xf32>,
    %c1_64 = arith.constant 1 : index
    %c0_65 = arith.constant 0 : index
    %70 = tpu.strided_load %arg10[%c1_64, %c0_65] {strides = array<i32: 2, 1>} : memref<24x36xf32, #tpu.memory_space<vmem>>, vector<8x36xf32>
    %c0_66 = arith.constant 0 : index
    %c36_67 = arith.constant 36 : index
    %71 = vector.load %arg11[%c0_66, %c36_67] : memref<24x240xf32, #tpu.memory_space<vmem>>, vector<8x36xf32>
    tpu.vector_store %arg11[%c0_66, %c36_67], %70 {strides = array<i32>} : memref<24x240xf32, #tpu.memory_space<vmem>>, vector<8x36xf32>,
    %c2_68 = arith.constant 2 : index
    %c0_69 = arith.constant 0 : index
    %72 = tpu.strided_load %arg10[%c2_68, %c0_69] {strides = array<i32: 2, 1>} : memref<24x36xf32, #tpu.memory_space<vmem>>, vector<8x36xf32>
    %c0_70 = arith.constant 0 : index
    %c72 = arith.constant 72 : index
    %73 = vector.load %arg11[%c0_70, %c72] : memref<24x240xf32, #tpu.memory_space<vmem>>, vector<8x36xf32>
    tpu.vector_store %arg11[%c0_70, %c72], %72 {strides = array<i32>} : memref<24x240xf32, #tpu.memory_space<vmem>>, vector<8x36xf32>,
    %c3_71 = arith.constant 3 : index
    %c0_72 = arith.constant 0 : index
    %74 = tpu.strided_load %arg10[%c3_71, %c0_72] {strides = array<i32: 2, 1>} : memref<24x36xf32, #tpu.memory_space<vmem>>, vector<8x36xf32>
    %c0_73 = arith.constant 0 : index
    %c108 = arith.constant 108 : index
    %75 = vector.load %arg11[%c0_73, %c108] : memref<24x240xf32, #tpu.memory_space<vmem>>, vector<8x36xf32>
    tpu.vector_store %arg11[%c0_73, %c108], %74 {strides = array<i32>} : memref<24x240xf32, #tpu.memory_space<vmem>>, vector<8x36xf32>,
    %c0_74 = arith.constant 0 : index
    %c0_75 = arith.constant 0 : index
    %76 = vector.load %arg11[%c0_74, %c0_75] : memref<24x240xf32, #tpu.memory_space<vmem>>, vector<8x144xf32>
    %77 = arith.truncf %76 : vector<8x144xf32> to vector<8x144xbf16>
    %c0_76 = arith.constant 0 : index
    %c0_77 = arith.constant 0 : index
    %78 = vector.load %arg5[%c0_76, %c0_77] : memref<144x8xbf16, #tpu.memory_space<vmem>>, vector<144x8xbf16>
    %cst_78 = arith.constant dense<0.000000e+00> : vector<8x8xf32>
    %79 = tpu.matmul %77, %78, %cst_78 {dimension_numbers = #tpu.dot_dimension_numbers<[1], [0], [0], [1], [0, 0, 1, 1], [], []>} : vector<8x144xbf16>, vector<144x8xbf16>, vector<8x8xf32> -> vector<8x8xf32>
    %80 = vector.extract_strided_slice %79 {offsets = [0, 0], sizes = [8, 2], strides = [1, 1]} : vector<8x8xf32> to vector<8x2xf32>
    %81 = vector.extract_strided_slice %79 {offsets = [0, 2], sizes = [8, 2], strides = [1, 1]} : vector<8x8xf32> to vector<8x2xf32>
    %82 = arith.maximumf %80, %81 : vector<8x2xf32>
    %83 = vector.extract_strided_slice %79 {offsets = [0, 4], sizes = [8, 2], strides = [1, 1]} : vector<8x8xf32> to vector<8x2xf32>
    %84 = vector.extract_strided_slice %79 {offsets = [0, 6], sizes = [8, 2], strides = [1, 1]} : vector<8x8xf32> to vector<8x2xf32>
    %85 = arith.maximumf %83, %84 : vector<8x2xf32>
    %86 = arith.maximumf %82, %85 : vector<8x2xf32>
    %c0_79 = arith.constant 0 : index
    %c0_80 = arith.constant 0 : index
    %87 = vector.load %arg6[%c0_79, %c0_80] : memref<1x2xf32, #tpu.memory_space<vmem>>, vector<1x2xf32>
    %88 = vector.broadcast %87 : vector<1x2xf32> to vector<8x2xf32>
    %89 = arith.addf %86, %88 : vector<8x2xf32>
    %cst_81 = arith.constant 5.000000e-01 : f32
    %90 = vector.broadcast %cst_81 : f32 to vector<8x2xf32>
    %91 = arith.mulf %90, %89 : vector<8x2xf32>
    %92 = math.tanh %91 : vector<8x2xf32>
    %cst_82 = arith.constant 1.000000e+00 : f32
    %93 = vector.broadcast %cst_82 : f32 to vector<8x2xf32>
    %94 = arith.addf %92, %93 : vector<8x2xf32>
    %cst_83 = arith.constant 5.000000e-01 : f32
    %95 = vector.broadcast %cst_83 : f32 to vector<8x2xf32>
    %96 = arith.mulf %95, %94 : vector<8x2xf32>
    %97 = vector.extract_strided_slice %96 {offsets = [0, 0], sizes = [2, 2], strides = [1, 1]} : vector<8x2xf32> to vector<2x2xf32>
    %c0_84 = arith.constant 0 : index
    %c0_85 = arith.constant 0 : index
    %c0_86 = arith.constant 0 : index
    %98 = vector.load %arg7[%c0_84, %c0_85, %c0_86] : memref<2x2x2xf32, #tpu.memory_space<vmem>>, vector<1x2x2xf32>
    %99 = vector.shape_cast %98 : vector<1x2x2xf32> to vector<2x2xf32>
    %100 = vector.shape_cast %97 : vector<2x2xf32> to vector<1x2x2xf32>
    tpu.vector_store %arg7[%c0_84, %c0_85, %c0_86], %100 {strides = array<i32>} : memref<2x2x2xf32, #tpu.memory_space<vmem>>, vector<1x2x2xf32>,
    %101 = vector.extract_strided_slice %96 {offsets = [4, 0], sizes = [2, 2], strides = [1, 1]} : vector<8x2xf32> to vector<2x2xf32>
    %c1_87 = arith.constant 1 : index
    %c0_88 = arith.constant 0 : index
    %c0_89 = arith.constant 0 : index
    %102 = vector.load %arg7[%c1_87, %c0_88, %c0_89] : memref<2x2x2xf32, #tpu.memory_space<vmem>>, vector<1x2x2xf32>
    %103 = vector.shape_cast %102 : vector<1x2x2xf32> to vector<2x2xf32>
    %104 = vector.shape_cast %101 : vector<2x2xf32> to vector<1x2x2xf32>
    tpu.vector_store %arg7[%c1_87, %c0_88, %c0_89], %104 {strides = array<i32>} : memref<2x2x2xf32, #tpu.memory_space<vmem>>, vector<1x2x2xf32>,
    return
  }
}

</mosaic_0001>

<bundles_post_ra>
// kernel: tile.18
= control target key start
LH: loop header
LB: loop body
LE: loop exit
PB: predicated region body
PF: predicated region fallthrough
CT: control target
= control target key end

     0   :  { %s22_s0 = inlined_call_operand.vmem [shape: f32[6], index: 0, kind: input, shape index: {}]   ;;  %s23_s1 = inlined_call_operand.vmem [shape: f32[8,6], index: 1, kind: output, shape index: {}]  }
   0x1   :  { %v4_v0 = vld [vmem:[%s22_s0] ss:$0 sm:$0xff] }
   0x2   :  { %5 = vst [vmem:[%s23_s1] sm:$0xff] %v4_v0 }

// kernel: tile.23
= control target key start
LH: loop header
LB: loop body
LE: loop exit
PB: predicated region body
PF: predicated region fallthrough
CT: control target
= control target key end

     0   :  { %s22_s0 = inlined_call_operand.vmem [shape: f32[6], index: 0, kind: input, shape index: {}]   ;;  %s23_s1 = inlined_call_operand.vmem [shape: f32[4,6], index: 1, kind: output, shape index: {}]  }
   0x1   :  { %v4_v0 = vld [vmem:[%s22_s0] ss:$0 sm:$0xff] }
   0x2   :  { %5 = vst [vmem:[%s23_s1] sm:$0xf] %v4_v0 }

// kernel: tile.19
= control target key start
LH: loop header
LB: loop body
LE: loop exit
PB: predicated region body
PF: predicated region fallthrough
CT: control target
= control target key end

     0   :  { %s69_s10 = smov 42   ;;  %s70_s11 = smov 30   ;;  %vm3_vm0 = vcmask 48128   ;;  %vm9_vm1 = vcmask 392528   ;;  %vm15_vm2 = vcmask 343328   ;;  %vm21_vm3 = vcmask 294128   ;;  %s113_s0 = inlined_call_operand.vmem [shape: f32[8,6], index: 0, kind: input, shape index: {}]   ;;  %s114_s1 = inlined_call_operand.vmem [shape: f32[1,48], index: 1, kind: output, shape index: {}]  }
   0x1   :  { %v55_v0 = vld [vmem:[%s113_s0 + $0x7] sm:$0x1]   ;;  %v57_v1 = vld [vmem:[%s113_s0 + $0x5] sm:$0x1]   ;;  %v56_v2 = vld [vmem:[%s113_s0 + $0x6] sm:$0x1]  }
   0x2   :  { %7 = vrot.lane.b32.xlu0 %v55_v0, %s69_s10  ;;  %19 = vrot.lane.b32.xlu1 %v57_v1, %s70_s11  ;;  %v58_v3 = vld [vmem:[%s113_s0 + $0x4] sm:$0x1]   ;;  %v2_v4 = vld [vmem:[%s113_s0] sm:$0x1]   ;;  %s71_s18 = smov 36   ;;  %s72_s19 = smov 24  }
   0x3   :  { %4 = vst.msk [vmem:[#allocation0] sm:$0x1] %vm3_vm0, %v2_v4   ;;  %v59_v5 = vld [vmem:[%s113_s0 + $0x3] sm:$0x1]   ;;  %v60_v6 = vld [vmem:[%s113_s0 + $0x2] sm:$0x1]  }
   0x4   :  { %s73_s24 = smov 18   ;;  %s74_s25 = smov 12   ;;  %v61_v7 = vld [vmem:[%s113_s0 + $0x1] sm:$0x1]   ;;  %vm27_vm4 = vcmask 244928   ;;  %vm33_vm5 = vcmask 195728  }
   0x5   :  { %s75_s0 = smov 6   ;;  %vm39_vm6 = vcmask 146528   ;;  %vm45_vm7 = vcmask 97328  }
   0x6   :  { %13 = vrot.lane.b32.xlu0 %v56_v2, %s71_s18  ;;  %25 = vrot.lane.b32.xlu1 %v58_v3, %s72_s19 }
   0xa   :  { %31 = vrot.lane.b32.xlu0 %v59_v5, %s73_s24  ;;  %37 = vrot.lane.b32.xlu1 %v60_v6, %s74_s25 }
   0xe   :  { %43 = vrot.lane.b32.xlu0 %v61_v7, %s75_s0 }
  0x74   :  { %v8_v8 = vpop.permute.xlu0 %7   ;;  %v20_v9 = vpop.permute.xlu1 %19  }
  0x75   :  { %10 = vst.msk [vmem:[#allocation0] sm:$0x1] %vm9_vm1, %v8_v8  }
  0x78   :  { %v14_v10 = vpop.permute.xlu0 %13   ;;  %v26_v11 = vpop.permute.xlu1 %25  }
  0x79   :  { %16 = vst.msk [vmem:[#allocation0] sm:$0x1] %vm15_vm2, %v14_v10  }
  0x7a   :  { %22 = vst.msk [vmem:[#allocation0] sm:$0x1] %vm21_vm3, %v20_v9  }
  0x7b   :  { %28 = vst.msk [vmem:[#allocation0] sm:$0x1] %vm27_vm4, %v26_v11  }
  0x7c   :  { %v32_v12 = vpop.permute.xlu0 %31   ;;  %v38_v13 = vpop.permute.xlu1 %37  }
  0x7d   :  { %34 = vst.msk [vmem:[#allocation0] sm:$0x1] %vm33_vm5, %v32_v12  }
  0x7e   :  { %40 = vst.msk [vmem:[#allocation0] sm:$0x1] %vm39_vm6, %v38_v13  }
  0x80   :  { %v44_v14 = vpop.permute.xlu0 %43  }
  0x81   :  { %46 = vst.msk [vmem:[#allocation0] sm:$0x1] %vm45_vm7, %v44_v14  }
  0x88   :  { %v51_v15 = vld [vmem:[#allocation0] sm:$0x1] }
  0x89   :  { %54 = vst [vmem:[%s114_s1] sm:$0x1] %v51_v15 }

// kernel: tile.24
= control target key start
LH: loop header
LB: loop body
LE: loop exit
PB: predicated region body
PF: predicated region fallthrough
CT: control target
= control target key end

     0   :  { %vm8_vm0 = vcmask 48128   ;;  %s40_s8 = smov 6   ;;  %s41_s9 = smov 12   ;;  %vm14_vm1 = vcmask 195728   ;;  %vm20_vm2 = vcmask 146528   ;;  %vm26_vm3 = vcmask 97328   ;;  %s58_s0 = inlined_call_operand.vmem [shape: f32[4,6], index: 0, kind: input, shape index: {}]   ;;  %s59_s1 = inlined_call_operand.vmem [shape: f32[1,24], index: 1, kind: output, shape index: {}]  }
   0x1   :  { %v5_v0 = vld [vmem:[%s58_s0] sm:$0xf]  ;;  %s39_s0 = smov 18  }
   0x2   :  { %6 = vst [vmem:[#allocation1] sm:$0xf] %v5_v0 }
   0x9   :  { %v11_v1 = vld [vmem:[#allocation1 + $0x3] sm:$0x1]   ;;  %v23_v2 = vld [vmem:[#allocation1 + $0x1] sm:$0x1]   ;;  %v7_v3 = vld [vmem:[#allocation1] sm:$0x1]  }
   0xa   :  { %12 = vrot.lane.b32.xlu0 %v11_v1, %s39_s0  ;;  %24 = vrot.lane.b32.xlu1 %v23_v2, %s40_s8  ;;  %v17_v4 = vld [vmem:[#allocation1 + $0x2] sm:$0x1]   ;;  %9 = vst.msk [vmem:[#allocation0] sm:$0x1] %vm8_vm0, %v7_v3  }
   0xe   :  { %18 = vrot.lane.b32.xlu0 %v17_v4, %s41_s9 }
  0x7c   :  { %v13_v5 = vpop.permute.xlu0 %12   ;;  %v25_v6 = vpop.permute.xlu1 %24  }
  0x7d   :  { %15 = vst.msk [vmem:[#allocation0] sm:$0x1] %vm14_vm1, %v13_v5  }
  0x80   :  { %v19_v7 = vpop.permute.xlu0 %18  }
  0x81   :  { %21 = vst.msk [vmem:[#allocation0] sm:$0x1] %vm20_vm2, %v19_v7  }
  0x82   :  { %27 = vst.msk [vmem:[#allocation0] sm:$0x1] %vm26_vm3, %v25_v6  }
  0x89   :  { %v32_v8 = vld [vmem:[#allocation0] sm:$0x1] }
  0x8a   :  { %35 = vst [vmem:[%s59_s1] sm:$0x1] %v32_v8 }

// kernel: cnn_forward.1
= control target key start
LH: loop header
LB: loop body
LE: loop exit
PB: predicated region body
PF: predicated region fallthrough
CT: control target
= control target key end

     0   :  { %vm28_vm0 = vcmask 146432   ;;  %s955_s30 = smov 1   ;;  %v956_v4 = vmov 0.0   ;;  %vm214_vm1 = vcmask 1043456   ;;  %s1224_s0 = inlined_call_operand.vmem [shape: f32[2,16,16], index: 0, kind: input, shape index: {}]   ;;  %s1225_s1 = inlined_call_operand.vmem [shape: bf16[72,192], index: 1, kind: input, shape index: {}]   ;;  %s1226_s2 = inlined_call_operand.vmem [shape: f32[1,48], index: 2, kind: input, shape index: {}]   ;;  %s1227_s3 = inlined_call_operand.vmem [shape: bf16[240,96], index: 3, kind: input, shape index: {}]   ;;  %s1228_s4 = inlined_call_operand.vmem [shape: f32[1,24], index: 4, kind: input, shape index: {}]   ;;  %s1229_s5 = inlined_call_operand.vmem [shape: bf16[144,8], index: 5, kind: input, shape index: {}]   ;;  %s1230_s6 = inlined_call_operand.vmem [shape: f32[1,2], index: 6, kind: input, shape index: {}]   ;;  %s1231_s7 = inlined_call_operand.hbm [shape: f32[2,2,2], index: 7, kind: output, shape index: {}]  }
   0x1   :  { %v830_v0 = vld [vmem:[%s1224_s0 + $0x10] sm:$0xff]  ;;  %v44_v1 = vld [vmem:[%s1224_s0] sm:$0xff]  ;;  %v831_v2 = vld [vmem:[%s1224_s0 + $0x18] sm:$0xff]  ;;  %31 = vst.msk [vmem:[#allocation2 + $0x10] sm:$0xff] %vm28_vm0, %v956_v4 }
   0x2   :  { %62 = vrot.lane.b32.xlu1 %v830_v0, %s955_s30  ;;  %48 = vrot.lane.b32.xlu0 %v44_v1, %s955_s30  ;;  %v45_v3 = vld [vmem:[%s1224_s0 + $0x8] sm:$0xff]  ;;  %32 = vst.msk [vmem:[#allocation2 + $0x18] sm:$0xff] %vm28_vm0, %v956_v4  ;;  %29 = vst.msk [vmem:[#allocation2] sm:$0xff] %vm28_vm0, %v956_v4  ;;  %v161_v5 = vld [vmem:[%s1225_s1 + $0x40] sm:$0xff] }
   0x3   :  { %30 = vst.msk [vmem:[#allocation2 + $0x8] sm:$0xff] %vm28_vm0, %v956_v4  ;;  %33 = vst.msk [vmem:[#allocation2 + $0x20] sm:$0xff] %vm28_vm0, %v956_v4  ;;  %v841_v6 = vcombine.high %v161_v5, %v161_v5  ;;  %v840_v7 = vcombine.low %v161_v5, %v161_v5 }
   0x4   :  { %34 = vst.msk [vmem:[#allocation2 + $0x28] sm:$0xff] %vm28_vm0, %v956_v4 }
   0x5   :  { %842 = vmatprep.subr.msk.bf16.mxu0 %vm214_vm1, %v841_v6  ;;  %v216_v8 = vsel %vm214_vm1, %v840_v7, 0 }
   0x6   :  { %64 = vrot.lane.b32.xlu1 %v831_v2, %s955_s30  ;;  %50 = vrot.lane.b32.xlu0 %v45_v3, %s955_s30 }
   0x7   :  { %228 = vmatpush1.bf16.msra.mxu0 %v216_v8 }
   0x8   :  { %12 = vsyncpa [#allocation7], 0  ;;  %vm54_vm2 = vcmask 138248   ;;  %v895_v11 = vld [vmem:[%s1225_s1 + $0x34] ss:$8 sps:$4 sm:$0xff]   ;;  %s957_s23 = smov 18  }
   0x9   :  { %v897_v12 = vld [vmem:[%s1225_s1 + $0x30] ss:$8 sps:$4 sm:$0xff]   ;;  %229 = vmatprep.subr.bf16.mxu0 %v895_v11  ;;  %v898_v15 = vld [vmem:[%s1225_s1 + $0x24] ss:$8 sps:$4 sm:$0xff]   ;;  %v900_v16 = vld [vmem:[%s1225_s1 + $0x20] ss:$8 sps:$4 sm:$0xff]  }
   0xa   :  { %v901_v17 = vld [vmem:[%s1225_s1 + $0x14] ss:$8 sps:$4 sm:$0xff]   ;;  %v903_v18 = vld [vmem:[%s1225_s1 + $0x10] ss:$8 sps:$4 sm:$0xff]   ;;  %vm77_vm3 = vcmask 142336   ;;  %s958_s24 = smov 36  }
   0xb   :  { %230 = vmatpush1.bf16.msra.mxu0 %v897_v12  ;;  %v904_v26 = vld [vmem:[%s1225_s1 + $0x4] ss:$8 sps:$4 sm:$0xff]   ;;  %v906_v27 = vld [vmem:[%s1225_s1] ss:$8 sps:$4 sm:$0xff]   ;;  %v959_v28 = vmov 0   ;;  %s960_s29 = smov 54  }
   0xc   :  { %231 = vmatprep.subr.bf16.mxu0 %v898_v15  ;;  %253 = vmatprep.mubr.bf16.mxu0 %v959_v28  ;;  %vm97_vm4 = vcmask 294032   ;;  %vm120_vm5 = vcmask 441632   ;;  %vm143_vm6 = vcmask 589232   ;;  %vm100_vm7 = vcmask 289936   ;;  %s961_s1 = smov 80   ;;  %s962_s30 = smov 32  }
   0xd   :  { %554 = vmatprep.subr.bf16.mxu1 %v959_v28  ;;  %vm123_vm8 = vcmask 437536   ;;  %vm146_vm9 = vcmask 585136   ;;  %vm207_vm10 = vcmask 588800   ;;  %vm35_vm11 = vcmask 490496   ;;  %s963_s0 = smov 6   ;;  %s965_s12 = smov 120  }
   0xe   :  { %36 = vst.msk [vmem:[#allocation3] sm:$0xff] %vm35_vm11, %v956_v4  ;;  %37 = vst.msk [vmem:[#allocation3 + $0x8] sm:$0xff] %vm35_vm11, %v956_v4  ;;  %vm323_vm12 = vcmask 261120   ;;  %vm354_vm13 = vcmask 441392   ;;  %vm356_vm14 = vcmask 434224   ;;  %vm362_vm15 = vcmask 441394  }
   0xf   :  { %232 = vmatpush1.bf16.msra.mxu0 %v900_v16  ;;  %38 = vst.msk [vmem:[#allocation3 + $0x10] sm:$0xff] %vm35_vm11, %v956_v4  ;;  %39 = vst.msk [vmem:[#allocation3 + $0x18] sm:$0xff] %vm35_vm11, %v956_v4  ;;  %vm370_vm1 = vcmask 488448   ;;  %s966_s17 = smov 52   ;;  %s968_s15 = smov 72  }
  0x10   :  { %233 = vmatprep.subr.bf16.mxu0 %v901_v17  ;;  %s969_s16 = smov 108   ;;  %s972_s19 = smov [#allocation6]  }
  0x13   :  { %234 = vmatpush1.bf16.msra.mxu0 %v903_v18 }
  0x14   :  { %235 = vmatprep.subr.bf16.mxu0 %v904_v26 }
  0x17   :  { %236 = vmatpush1.bf16.msra.mxu0 %v906_v27  ;;  %v907_v27 = vld [vmem:[%s1227_s3 + $0x38] sm:$0xff]  }
  0x18   :  { %747 = vmatprep.subr.bf16.mxu0 %v959_v28  ;;  %555 = vmatpush1.bf16.msra.mxu1 %v907_v27  ;;  %v928_v27 = vld [vmem:[%s1229_s5 + $0x8] sm:$0xff]  }
  0x19   :  { %556 = vmatprep.subr.bf16.mxu1 %v959_v28 }
  0x74   :  { %v63_v9 = vpop.permute.xlu1 %62  ;;  %v49_v10 = vpop.permute.xlu0 %48 }
  0x75   :  { %68 = vst.msk [vmem:[#allocation2 + $0x16] sm:$0xff] %vm54_vm2, %v63_v9  ;;  %55 = vst.msk [vmem:[#allocation2 + $0x2] sm:$0xff] %vm54_vm2, %v49_v10  ;;  %v845_v9 = vld [vmem:[%s1226_s2] ss:$0 sm:$0xff]  ;;  %s964_s2 = smov 60  }
  0x78   :  { %v65_v13 = vpop.permute.xlu1 %64  ;;  %v51_v14 = vpop.permute.xlu0 %50 }
  0x79   :  { %69 = vst.msk [vmem:[#allocation2 + $0x1e] sm:$0xff] %vm54_vm2, %v65_v13  ;;  %56 = vst.msk [vmem:[#allocation2 + $0xa] sm:$0xff] %vm54_vm2, %v51_v14  ;;  %vm384_vm2 = vcmask 982496  }
  0x80   :  { %v82_v19 = vld [vmem:[#allocation2 + $0x11] ss:$2 sm:$0xff]  ;;  %v80_v20 = vld [vmem:[#allocation2 + $0x1] ss:$2 sm:$0xff]  ;;  %v105_v21 = vld [vmem:[#allocation2 + $0x12] ss:$2 sm:$0xff] }
  0x81   :  { %90 = vrot.lane.b32.xlu1 %v82_v19, %s957_s23  ;;  %88 = vrot.lane.b32.xlu0 %v80_v20, %s957_s23  ;;  %v103_v22 = vld [vmem:[#allocation2 + $0x2] ss:$2 sm:$0xff]  ;;  %v128_v29 = vld [vmem:[#allocation2 + $0x13] ss:$2 sm:$0xff]  ;;  %v126_v30 = vld [vmem:[#allocation2 + $0x3] ss:$2 sm:$0xff] }
  0x82   :  { %v72_v23 = vld [vmem:[#allocation2 + $0x10] ss:$2 sm:$0xff]  ;;  %v70_v24 = vld [vmem:[#allocation2] ss:$2 sm:$0xff] }
  0x83   :  { %76 = vst.msk [vmem:[#allocation5 + $0x10] sm:$0xff] %vm28_vm0, %v72_v23  ;;  %v74_v25 = vld [vmem:[#allocation2 + $0x20] ss:$2 sm:$0xf]  ;;  %75 = vst.msk [vmem:[#allocation5] sm:$0xff] %vm28_vm0, %v70_v24  ;;  %vm364_vm0 = vcmask 436272  }
  0x84   :  { %78 = vst.msk [vmem:[#allocation5 + $0x20] sm:$0xf] %vm77_vm3, %v74_v25  ;;  %v107_v31 = vld [vmem:[#allocation2 + $0x22] ss:$2 sm:$0xf]  ;;  %vm400_vm3 = vcmask 1048512  }
  0x85   :  { %113 = vrot.lane.b32.xlu1 %v105_v21, %s958_s24  ;;  %111 = vrot.lane.b32.xlu0 %v103_v22, %s958_s24  ;;  %v84_v32 = vld [vmem:[#allocation2 + $0x21] ss:$2 sm:$0xf] }
  0x86   :  { %v130_v33 = vld [vmem:[#allocation2 + $0x23] ss:$2 sm:$0xf] }
  0x89   :  { %136 = vrot.lane.b32.xlu1 %v128_v29, %s960_s29  ;;  %134 = vrot.lane.b32.xlu0 %v126_v30, %s960_s29  ;;  %v908_v29 = vld [vmem:[%s1227_s3 + $0x30] sm:$0xff]   ;;  %v909_v30 = vld [vmem:[%s1227_s3 + $0x28] sm:$0xff]  }
  0x8a   :  { %557 = vmatpush1.bf16.msra.mxu1 %v908_v29  ;;  %v929_v29 = vld [vmem:[%s1229_s5] sm:$0xff]  }
  0x8b   :  { %558 = vmatprep.subr.bf16.mxu1 %v959_v28 }
  0x8d   :  { %115 = vrot.lane.b32.xlu1 %v107_v31, %s958_s24  ;;  %92 = vrot.lane.b32.xlu0 %v84_v32, %s957_s23  ;;  %v910_v31 = vld [vmem:[%s1227_s3 + $0x20] sm:$0xff]   ;;  %v911_v32 = vld [vmem:[%s1227_s3 + $0x18] sm:$0xff]  }
  0x8e   :  { %559 = vmatpush1.bf16.msra.mxu1 %v909_v30  ;;  %v930_v30 = vld [vmem:[%s1229_s5 + $0x40] sm:$0xff]  }
  0x8f   :  { %560 = vmatprep.subr.bf16.mxu1 %v959_v28 }
  0x91   :  { %138 = vrot.lane.b32.xlu0 %v130_v33, %s960_s29  ;;  %v912_v33 = vld [vmem:[%s1227_s3 + $0x10] sm:$0xff]  }
  0x92   :  { %561 = vmatpush1.bf16.msra.mxu1 %v910_v31 }
  0x93   :  { %562 = vmatprep.subr.bf16.mxu1 %v959_v28 }
  0x96   :  { %563 = vmatpush1.bf16.msra.mxu1 %v911_v32 }
  0x97   :  { %564 = vmatprep.subr.bf16.mxu1 %v959_v28 }
  0x9a   :  { %565 = vmatpush1.bf16.msra.mxu1 %v912_v33 }
  0x9b   :  { %566 = vmatprep.subr.bf16.mxu1 %v959_v28 }
  0xf3   :  { %v91_v34 = vpop.permute.xlu1 %90  ;;  %v89_v35 = vpop.permute.xlu0 %88 }
  0xf4   :  { %99 = vst.msk [vmem:[#allocation5 + $0x10] sm:$0xff] %vm97_vm4, %v91_v34  ;;  %98 = vst.msk [vmem:[#allocation5] sm:$0xff] %vm97_vm4, %v89_v35  ;;  %v913_v34 = vld [vmem:[%s1227_s3 + $0x8] sm:$0xff]   ;;  %v914_v35 = vld [vmem:[%s1227_s3] sm:$0xff]   ;;  %vm402_vm4 = vcmask 424960  }
  0xf5   :  { %567 = vmatpush1.bf16.msra.mxu1 %v913_v34 }
  0xf6   :  { %568 = vmatprep.subr.bf16.mxu1 %v959_v28 }
  0xf7   :  { %v114_v36 = vpop.permute.xlu1 %113  ;;  %v112_v37 = vpop.permute.xlu0 %111 }
  0xf8   :  { %122 = vst.msk [vmem:[#allocation5 + $0x10] sm:$0xff] %vm120_vm5, %v114_v36  ;;  %121 = vst.msk [vmem:[#allocation5] sm:$0xff] %vm120_vm5, %v112_v37  ;;  %v915_v36 = vld [vmem:[%s1227_s3 + $0x70] sm:$0xff]   ;;  %vm420_vm5 = vcmask 916896  }
  0xf9   :  { %569 = vmatpush1.bf16.msra.mxu1 %v914_v35 }
  0xfa   :  { %572 = vmatprep.subr.bf16.mxu1 %v959_v28 }
  0xfb   :  { %v137_v38 = vpop.permute.xlu1 %136  ;;  %v135_v39 = vpop.permute.xlu0 %134 }
  0xfc   :  { %145 = vst.msk [vmem:[#allocation5 + $0x10] sm:$0xff] %vm143_vm6, %v137_v38  ;;  %144 = vst.msk [vmem:[#allocation5] sm:$0xff] %vm143_vm6, %v135_v39  ;;  %v916_v38 = vld [vmem:[%s1227_s3 + $0x68] sm:$0xff]   ;;  %vm406_vm6 = vcmask 422912  }
  0xfd   :  { %573 = vmatpush2.bf16.msra.mxu1 %v915_v36 }
  0xfe   :  { %574 = vmatprep.subr.bf16.mxu1 %v959_v28 }
  0xff   :  { %v116_v40 = vpop.permute.xlu1 %115  ;;  %v93_v41 = vpop.permute.xlu0 %92 }
 0x100   :  { %101 = vst.msk [vmem:[#allocation5 + $0x20] sm:$0xf] %vm100_vm7, %v93_v41  ;;  %vm386_vm7 = vcmask 980448  }
 0x101   :  { %124 = vst.msk [vmem:[#allocation5 + $0x20] sm:$0xf] %vm123_vm8, %v116_v40  ;;  %575 = vmatpush2.bf16.msra.mxu1 %v916_v38  ;;  %v917_v40 = vld [vmem:[%s1227_s3 + $0x60] sm:$0xff]   ;;  %vm404_vm8 = vcmask 1046464  }
 0x102   :  { %576 = vmatprep.subr.bf16.mxu1 %v959_v28 }
 0x103   :  { %v139_v42 = vpop.permute.xlu0 %138  ;;  %v148_v43 = vld [vmem:[#allocation5] sm:$0xff]  ;;  %v149_v44 = vld [vmem:[#allocation5 + $0x10] sm:$0xff] }
 0x104   :  { %147 = vst.msk [vmem:[#allocation5 + $0x20] sm:$0xf] %vm146_vm9, %v139_v42  ;;  %v151_v45 = vpack.c.bf16 %v149_v44, %v148_v43  ;;  %v918_v43 = vld [vmem:[%s1227_s3 + $0x58] sm:$0xff]   ;;  %vm422_vm9 = vcmask 914848  }
 0x105   :  { %577 = vmatpush2.bf16.msra.mxu1 %v917_v40 }
 0x106   :  { %843 = vmatmul.mubr.msk.bf16.vlgmr.msra.gmra.mxu0 %vm207_vm10, %v151_v45  ;;  %578 = vmatprep.subr.bf16.mxu1 %v959_v28 }
 0x107   :  { %263 = vmatprep.mubr.bf16.mxu0 %v959_v28 }
 0x109   :  { %579 = vmatpush2.bf16.msra.mxu1 %v918_v43 }
 0x10a   :  { %580 = vmatprep.subr.bf16.mxu1 %v959_v28 }
 0x10b   :  { %v150_v46 = vld [vmem:[#allocation5 + $0x20] sm:$0xf] }
 0x10c   :  { %v152_v47 = vpack.c.bf16 %v150_v46, %v150_v46  ;;  %v919_v46 = vld [vmem:[%s1227_s3 + $0x50] sm:$0xff]  }
 0x10d   :  { %581 = vmatpush2.bf16.msra.mxu1 %v919_v46 }
 0x10e   :  { %844 = vmatmul.mubr.msk.bf16.gmra.mxu0 %vm207_vm10, %v152_v47  ;;  %v920_v47 = vld [vmem:[%s1227_s3 + $0x48] sm:$0xff]   ;;  %582 = vmatprep.subr.bf16.mxu1 %v959_v28  ;;  %vm550_vm10 = vcmask 916480  }
 0x111   :  { %583 = vmatpush2.bf16.msra.mxu1 %v920_v47  ;;  %v873_v47 = vld [vmem:[%s1230_s6] ss:$0 sm:$0xff] }
 0x112   :  { %584 = vmatprep.subr.bf16.mxu1 %v959_v28 }
 0x1c6   :  { %v255_v48 = vpop.f32.mrf.mxu0 }
 0x1c8   :  { %v257_v49 = vpop.f32.mrf.mxu0 }
 0x1c9   :  { %290 = vrot.lane.b32.xlu1 %v257_v49, %s961_s1 }
 0x1ca   :  { %v259_v50 = vpop.f32.mrf.mxu0 }
 0x1cc   :  { %v261_v51 = vpop.f32.mrf.mxu0 }
 0x1cd   :  { %292 = vrot.lane.b32.xlu0 %v261_v51, %s961_s1 }
 0x1ce   :  { %v265_v52 = vpop.f32.mrf.mxu0 }
 0x1d0   :  { %v267_v53 = vpop.f32.mrf.mxu0 }
 0x1d1   :  { %275 = vrot.lane.b32.xlu0 %v255_v48, %s961_s1  ;;  %294 = vrot.lane.b32.xlu1 %v267_v53, %s961_s1 }
 0x1d2   :  { %v269_v54 = vpop.f32.mrf.mxu0 }
 0x1d4   :  { %v270_v55 = vpop.f32.mrf.mxu0 }
 0x1d5   :  { %279 = vrot.lane.b32.xlu0 %v265_v52, %s961_s1  ;;  %277 = vrot.lane.b32.xlu1 %v259_v50, %s961_s1 }
 0x23b   :  { %v291_v56 = vpop.permute.xlu1 %290 }
 0x23c   :  { %v299_v57 = vmax.f32 %v255_v48, %v291_v56  ;;  %v300_v58 = vmax.f32 %v257_v49, %v291_v56 }
 0x23e   :  { %313 = vrot.lane.b32.xlu0 %v300_v58, %s962_s30  ;;  %311 = vrot.lane.b32.xlu1 %v299_v57, %s962_s30 }
 0x23f   :  { %v293_v59 = vpop.permute.xlu0 %292 }
 0x240   :  { %v301_v60 = vmax.f32 %v259_v50, %v293_v59  ;;  %v302_v61 = vmax.f32 %v261_v51, %v293_v59  ;;  %v921_v51 = vld [vmem:[%s1227_s3 + $0x40] sm:$0xff]   ;;  %s967_s3 = smov 104  }
 0x241   :  { %585 = vmatpush2.bf16.msra.mxu1 %v921_v51 }
 0x242   :  { %317 = vrot.lane.b32.xlu0 %v302_v61, %s962_s30  ;;  %315 = vrot.lane.b32.xlu1 %v301_v60, %s962_s30 }
 0x243   :  { %v295_v62 = vpop.permute.xlu1 %294  ;;  %v276_v1 = vpop.permute.xlu0 %275 }
 0x244   :  { %v303_v63 = vmax.f32 %v265_v52, %v295_v62  ;;  %v304_v0 = vmax.f32 %v267_v53, %v295_v62  ;;  %v284_v5 = vmax.f32 %v255_v48, %v276_v1 }
 0x246   :  { %321 = vrot.lane.b32.xlu0 %v304_v0, %s962_s30  ;;  %319 = vrot.lane.b32.xlu1 %v303_v63, %s962_s30 }
 0x247   :  { %v280_v2 = vpop.permute.xlu0 %279  ;;  %v278_v3 = vpop.permute.xlu1 %277 }
 0x248   :  { %v285_v11 = vmax.f32 %v259_v50, %v278_v3  ;;  %v286_v18 = vmax.f32 %v265_v52, %v280_v2 }
 0x2b0   :  { %v314_v6 = vpop.permute.xlu0 %313  ;;  %v312_v7 = vpop.permute.xlu1 %311 }
 0x2b1   :  { %v324_v8 = vsel %vm323_vm12, %v312_v7, %v314_v6 }
 0x2b2   :  { %v330_v10 = vmax.f32 %v284_v5, %v324_v8 }
 0x2b4   :  { %v318_v12 = vpop.permute.xlu0 %317  ;;  %v316_v13 = vpop.permute.xlu1 %315  ;;  %v340_v14 = vadd.f32 %v845_v9, %v330_v10 }
 0x2b5   :  { %v325_v15 = vsel %vm323_vm12, %v316_v13, %v318_v12 }
 0x2b6   :  { %v331_v16 = vmax.f32 %v285_v11, %v325_v15  ;;  %v343_v17 = vmax.f32 %v340_v14, 0.0  ;;  %v862_v11 = vld [vmem:[%s1228_s4] ss:$0 sm:$0xff] }
 0x2b8   :  { %v322_v19 = vpop.permute.xlu0 %321  ;;  %348 = vrot.lane.b32.xlu1 %v343_v17, %s963_s0  ;;  %v320_v20 = vpop.permute.xlu1 %319  ;;  %v341_v21 = vadd.f32 %v845_v9, %v331_v16 }
 0x2b9   :  { %v326_v22 = vsel %vm323_vm12, %v320_v20, %v322_v19  ;;  %v922_v19 = vld [vmem:[%s1229_s5 + $0x38] sm:$0xff]   ;;  %v923_v20 = vld [vmem:[%s1229_s5 + $0x30] sm:$0xff]   ;;  %vm630_vm12 = vcmask 241712  }
 0x2ba   :  { %v332_v23 = vmax.f32 %v286_v18, %v326_v22  ;;  %v344_v24 = vmax.f32 %v341_v21, 0.0  ;;  %748 = vmatpush1.bf16.msra.mxu0 %v922_v19  ;;  %v924_v21 = vld [vmem:[%s1229_s5 + $0x28] sm:$0xff]   ;;  %v925_v22 = vld [vmem:[%s1229_s5 + $0x20] sm:$0xff]  }
 0x2bb   :  { %749 = vmatprep.subr.bf16.mxu0 %v959_v28 }
 0x2bc   :  { %350 = vrot.lane.b32.xlu0 %v344_v24, %s963_s0  ;;  %v342_v25 = vadd.f32 %v845_v9, %v332_v23  ;;  %v926_v23 = vld [vmem:[%s1229_s5 + $0x18] sm:$0xff]  }
 0x2be   :  { %v345_v26 = vmax.f32 %v342_v25, 0.0  ;;  %750 = vmatpush1.bf16.msra.mxu0 %v923_v20  ;;  %v927_v25 = vld [vmem:[%s1229_s5 + $0x10] sm:$0xff]   ;;  %s970_s5 = smov 126  }
 0x2bf   :  { %751 = vmatprep.subr.bf16.mxu0 %v959_v28 }
 0x2c0   :  { %359 = vrot.lane.b32.xlu1 %v345_v26, %s963_s0 }
 0x2c2   :  { %752 = vmatpush1.bf16.msra.mxu0 %v924_v21 }
 0x2c3   :  { %753 = vmatprep.subr.bf16.mxu0 %v959_v28 }
 0x2c6   :  { %754 = vmatpush1.bf16.msra.mxu0 %v925_v22 }
 0x2c7   :  { %755 = vmatprep.subr.bf16.mxu0 %v959_v28 }
 0x2ca   :  { %756 = vmatpush1.bf16.msra.mxu0 %v926_v23 }
 0x2cb   :  { %757 = vmatprep.subr.bf16.mxu0 %v959_v28 }
 0x2ce   :  { %758 = vmatpush1.bf16.msra.mxu0 %v927_v25 }
 0x2cf   :  { %759 = vmatprep.subr.bf16.mxu0 %v959_v28 }
 0x2d2   :  { %760 = vmatpush1.bf16.msra.mxu0 %v928_v27 }
 0x2d3   :  { %761 = vmatprep.subr.bf16.mxu0 %v959_v28 }
 0x2d6   :  { %762 = vmatpush1.bf16.msra.mxu0 %v929_v29 }
 0x2d7   :  { %777 = vmatprep.subr.bf16.mxu0 %v959_v28 }
 0x2da   :  { %778 = vmatpush2.bf16.msra.mxu0 %v930_v30 }
 0x32a   :  { %v349_v37 = vpop.permute.xlu1 %348 }
 0x32b   :  { %355 = vst.msk [vmem:[#allocation3 + $0x2] sm:$0xff] %vm354_vm13, %v349_v37  ;;  %vm636_vm13 = vcmask 244791  }
 0x32e   :  { %v351_v39 = vpop.permute.xlu0 %350 }
 0x32f   :  { %357 = vst.msk [vmem:[#allocation3 + $0xa] sm:$0x1] %vm356_vm14, %v351_v39  ;;  %vm638_vm14 = vcmask 240688  }
 0x330   :  { %363 = vst.msk [vmem:[#allocation3 + $0xe] sm:$0xfc] %vm362_vm15, %v351_v39  ;;  %vm648_vm15 = vcmask 589088  }
 0x332   :  { %v360_v41 = vpop.permute.xlu1 %359  ;;  %v373_v42 = vld [vmem:[#allocation3 + $0x1] ss:$2 sm:$0xff] }
 0x333   :  { %365 = vst.msk [vmem:[#allocation3 + $0x16] sm:$0x7] %vm364_vm0, %v360_v41  ;;  %378 = vrot.lane.b32.xlu0 %v373_v42, %s964_s2  ;;  %vm656_vm0 = vcmask 884288  }
 0x336   :  { %v366_v45 = vld [vmem:[#allocation3] ss:$2 sm:$0xff] }
 0x337   :  { %v389_v44 = vld [vmem:[#allocation3 + $0x2] ss:$2 sm:$0xff]  ;;  %369 = vst.msk [vmem:[#allocation5] sm:$0xff] %vm35_vm11, %v366_v45  ;;  %v409_v48 = vld [vmem:[#allocation3 + $0x3] ss:$2 sm:$0xff]  ;;  %vm40_vm11 = vcmask 293888  }
 0x338   :  { %394 = vrot.lane.b32.xlu0 %v389_v44, %s965_s12  ;;  %41 = vst.msk [vmem:[#allocation4] sm:$0xff] %vm40_vm11, %v956_v4  ;;  %42 = vst.msk [vmem:[#allocation4 + $0x8] sm:$0xff] %vm40_vm11, %v956_v4 }
 0x339   :  { %43 = vst.msk [vmem:[#allocation4 + $0x10] sm:$0xff] %vm40_vm11, %v956_v4 }
 0x33a   :  { %v391_v49 = vld [vmem:[#allocation3 + $0x12] ss:$2 sm:$0x3f]  ;;  %v375_v52 = vld [vmem:[#allocation3 + $0x11] ss:$2 sm:$0x3f] }
 0x33b   :  { %396 = vrot.lane.b32.xlu1 %v391_v49, %s965_s12  ;;  %v368_v50 = vld [vmem:[#allocation3 + $0x10] ss:$2 sm:$0x3f]  ;;  %v411_v53 = vld [vmem:[#allocation3 + $0x13] ss:$2 sm:$0x3f] }
 0x33c   :  { %414 = vrot.lane.b32.xlu0 %v409_v48, %s966_s17  ;;  %371 = vst.msk [vmem:[#allocation5 + $0x10] sm:$0x3f] %vm370_vm1, %v368_v50  ;;  %vm664_vm1 = vcmask 1048416  }
 0x33f   :  { %380 = vrot.lane.b32.xlu1 %v375_v52, %s964_s2 }
 0x343   :  { %416 = vrot.lane.b32.xlu1 %v411_v53, %s966_s17 }
 0x3a5   :  { %v379_v54 = vpop.permute.xlu0 %378 }
 0x3a6   :  { %385 = vst.msk [vmem:[#allocation5] sm:$0xff] %vm384_vm2, %v379_v54  ;;  %vm666_vm2 = vcmask 130048  }
 0x3aa   :  { %v395_v55 = vpop.permute.xlu0 %394 }
 0x3ab   :  { %401 = vst.msk [vmem:[#allocation5] sm:$0xff] %vm400_vm3, %v395_v55  ;;  %vm809_vm3 = vcmask 9216  }
 0x3ac   :  { %403 = vst.msk [vmem:[#allocation5 + $0x8] sm:$0xff] %vm402_vm4, %v395_v55  ;;  %vm812_vm4 = vcmask 13316  }
 0x3ad   :  { %v397_v57 = vpop.permute.xlu1 %396 }
 0x3ae   :  { %v415_v56 = vpop.permute.xlu0 %414  ;;  %407 = vst.msk [vmem:[#allocation5 + $0x18] sm:$0x3f] %vm406_vm6, %v397_v57 }
 0x3af   :  { %421 = vst.msk [vmem:[#allocation5 + $0x8] sm:$0xff] %vm420_vm5, %v415_v56 }
 0x3b1   :  { %v381_v58 = vpop.permute.xlu1 %380 }
 0x3b2   :  { %387 = vst.msk [vmem:[#allocation5 + $0x10] sm:$0x3f] %vm386_vm7, %v381_v58  ;;  %v424_v0 = vld [vmem:[#allocation5] sm:$0xff] }
 0x3b3   :  { %405 = vst.msk [vmem:[#allocation5 + $0x10] sm:$0x3f] %vm404_vm8, %v397_v57 }
 0x3b5   :  { %v417_v59 = vpop.permute.xlu1 %416 }
 0x3b6   :  { %423 = vst.msk [vmem:[#allocation5 + $0x18] sm:$0x3f] %vm422_vm9, %v417_v59  ;;  %v425_v61 = vld [vmem:[#allocation5 + $0x8] sm:$0xff] }
 0x3ba   :  { %v426_v60 = vld [vmem:[#allocation5 + $0x10] sm:$0x3f] }
 0x3bb   :  { %v428_v1 = vpack.c.bf16 %v426_v60, %v424_v0 }
 0x3bd   :  { %v427_v62 = vld [vmem:[#allocation5 + $0x18] sm:$0x3f] }
 0x3be   :  { %v429_v63 = vpack.c.bf16 %v427_v62, %v425_v61 }
 0x3c0   :  { %861 = vmatprep.mubr.msk.bf16.mxu1 %vm550_vm10, %v429_v63 }
 0x3c1   :  { %587 = vmatmul.mubr.bf16.vlgmr.msra.gmra.mxu1 %v428_v1 }
 0x481   :  { %v588_v2 = vpop.f32.mrf.mxu1 }
 0x482   :  { %597 = vrot.lane.b32.xlu0 %v588_v2, %s967_s3 }
 0x483   :  { %v590_v3 = vpop.f32.mrf.mxu1 }
 0x485   :  { %v591_v5 = vpop.f32.mrf.mxu1 }
 0x486   :  { %599 = vrot.lane.b32.xlu1 %v591_v5, %s967_s3  ;;  %s819_s3 = sshll.u32 %s972_s19, 4  ;;  %s820_s3 = int_to_ptr.vmem [resolvable:$true] %s819_s3 }
 0x487   :  { %v593_v6 = vpop.f32.mrf.mxu1  ;;  %s933_s20 = scalar_lea.vmem %s820_s3, 64  ;;  %p938_p1 = scmp.lt.s32.totalorder %s820_s3, %s820_s3 }
 0x488   :  { %p934_p0 = scmp.ne.s32.totalorder %s820_s3, %s933_s20  ;;  %p939_p2 = scmp.lt.s32.totalorder %s933_s20, %s933_s20 }
 0x48a   :  { %p940_p3 = por %p939_p2, %p938_p1 }
 0x48c   :  { %p941_p4 = pnand %p940_p3, %p934_p0 }
 0x4f4   :  { %v598_v7 = vpop.permute.xlu0 %597 }
 0x4f5   :  { %v603_v8 = vmax.f32 %v588_v2, %v598_v7 }
 0x4f7   :  { %607 = vrot.lane.b32.xlu0 %v603_v8, %s961_s1 }
 0x4f8   :  { %v600_v9 = vpop.permute.xlu1 %599 }
 0x4f9   :  { %v604_v10 = vmax.f32 %v591_v5, %v600_v9 }
 0x4fb   :  { %609 = vrot.lane.b32.xlu1 %v604_v10, %s961_s1 }
 0x569   :  { %v608_v12 = vpop.permute.xlu0 %607 }
 0x56a   :  { %v613_v13 = vmax.f32 %v603_v8, %v608_v12 }
 0x56c   :  { %v622_v14 = vadd.f32 %v862_v11, %v613_v13 }
 0x56d   :  { %v610_v15 = vpop.permute.xlu1 %609 }
 0x56e   :  { %v624_v16 = vmax.f32 %v622_v14, 0.0  ;;  %v614_v17 = vmax.f32 %v604_v10, %v610_v15 }
 0x570   :  { %v623_v18 = vadd.f32 %v862_v11, %v614_v17  ;;  %627 = vrot.lane.b32.xlu0 %v624_v16, %s963_s0 }
 0x572   :  { %v625_v4 = vmax.f32 %v623_v18, 0.0 }
 0x574   :  { %633 = vrot.lane.b32.xlu1 %v625_v4, %s963_s0 }
 0x5e2   :  { %v628_v24 = vpop.permute.xlu0 %627 }
 0x5e3   :  { %631 = vst.msk [vmem:[#allocation4 + $0x1] sm:$0x1f] %vm630_vm12, %v628_v24 }
 0x5e4   :  { %637 = vst.msk [vmem:[#allocation4 + $0x2] sm:$0x80] %vm636_vm13, %v628_v24 }
 0x5e6   :  { %v634_v26 = vpop.permute.xlu1 %633 }
 0x5e7   :  { %639 = vst.msk [vmem:[#allocation4 + $0xa] sm:$0xf] %vm638_vm14, %v634_v26 }
 0x5ee   :  { %v651_v31 = vld [vmem:[#allocation4 + $0x2] ss:$2 sm:$0xff]  ;;  %v643_v32 = vld [vmem:[#allocation4 + $0x1] ss:$2 sm:$0xff] }
 0x5ef   :  { %653 = vrot.lane.b32.xlu1 %v651_v31, %s968_s15  ;;  %645 = vrot.lane.b32.xlu0 %v643_v32, %s958_s24  ;;  %v640_v33 = vld [vmem:[#allocation4] ss:$2 sm:$0xff]  ;;  %v659_v34 = vld [vmem:[#allocation4 + $0x3] ss:$2 sm:$0xff]  ;;  %s971_s24 = smov 124  }
 0x5f0   :  { %641 = vst.msk [vmem:[#allocation5] sm:$0xff] %vm40_vm11, %v640_v33 }
 0x5f3   :  { %661 = vrot.lane.b32.xlu0 %v659_v34, %s969_s16 }
 0x661   :  { %v654_v35 = vpop.permute.xlu1 %653  ;;  %v646_v36 = vpop.permute.xlu0 %645 }
 0x662   :  { %649 = vst.msk [vmem:[#allocation5] sm:$0xff] %vm648_vm15, %v646_v36 }
 0x663   :  { %657 = vst.msk [vmem:[#allocation5] sm:$0xff] %vm656_vm0, %v654_v35 }
 0x665   :  { %v662_v28 = vpop.permute.xlu0 %661 }
 0x666   :  { %665 = vst.msk [vmem:[#allocation5] sm:$0xff] %vm664_vm1, %v662_v28 }
 0x667   :  { %667 = vst.msk [vmem:[#allocation5 + $0x8] sm:$0xff] %vm666_vm2, %v662_v28 }
 0x66d   :  { %v668_v38 = vld [vmem:[#allocation5] sm:$0xff] }
 0x66e   :  { %v669_v37 = vld [vmem:[#allocation5 + $0x8] sm:$0xff]  ;;  %v670_v40 = vpack.c.bf16 %v668_v38, %v668_v38 }
 0x66f   :  { %v671_v39 = vpack.c.bf16 %v669_v37, %v669_v37 }
 0x671   :  { %872 = vmatprep.mubr.msk.bf16.mxu0 %vm666_vm2, %v671_v39 }
 0x672   :  { %780 = vmatmul.mubr.bf16.vlgmr.msra.gmra.mxu0 %v670_v40 }
 0x732   :  { %v781_v41 = vpop.f32.mrf.mxu0 }
 0x733   :  { %788 = vrot.lane.b32.xlu1 %v781_v41, %s970_s5 }
 0x734   :  { %v783_v42 = vpop.f32.mrf.mxu0 }
 0x736   :  { %v784_v43 = vpop.f32.mrf.mxu0 }
 0x738   :  { %v785_v44 = vpop.f32.mrf.mxu0 }
 0x7a5   :  { %v789_v45 = vpop.permute.xlu1 %788 }
 0x7a6   :  { %v791_v46 = vmax.f32 %v781_v41, %v789_v45 }
 0x7a8   :  { %793 = vrot.lane.b32.xlu0 %v791_v46, %s971_s24 }
 0x81a   :  { %v794_v48 = vpop.permute.xlu0 %793 }
 0x81b   :  { %v796_v49 = vmax.f32 %v791_v46, %v794_v48 }
 0x81d   :  { %v804_v50 = vadd.f32 %v873_v47, %v796_v49 }
 0x81f   :  { %v805_v51 = vmul.f32 0.5, %v804_v50 }
 0x821   :  { %931 = vtanh.f32 %v805_v51 }
 0x82e   :  { %v932_v52 = vpop.eup %931 }
 0x82f   :  { %v807_v53 = vadd.f32 1.0, %v932_v52 }
 0x831   :  { %v808_v54 = vmul.f32 0.5, %v807_v53 }
 0x833   :  { %810 = vst.msk [vmem:[#allocation6] sm:$0x3] %vm809_vm3, %v808_v54 }
 0x834   :  { %813 = vst.msk [vmem:[#allocation6 - $0x2] sm:$0x30] %vm812_vm4, %v808_v54 }
 0x835   :  { %944 = shalt.err (!%p941_p4)
}
 0x836   :  { %s973_s6 = smov 2  }
 0x837   :  { %825 = dma.vmem_to_hbm [thread:$0]  %s820_s3, 64, %s1231_s7, [#allocation7], %s962_s30, %s962_s30, %s973_s6  }
 0x838   :  { %953 = dma.done.wait [#allocation7], 64  }
 0x839   :  { %954 = vsyncadd [#allocation7], 4294967232 }
 0x83a   :  { %829 = vsyncpa [#allocation7], 1 }

</bundles_post_ra>
